<compile_context>
chip_gen: v7x
topology: tpu7x:2x2x1
jax: 0.10.0
libtpu: 0.0.40
codegen_flags: <defaults>
</compile_context>

<pallas_src>
import jax
import jax.numpy as jnp
from jax.experimental import pallas as pl
from jax.experimental.pallas import tpu as pltpu


def _conv1x1_kernel(x_ref, w_ref, b_ref, o_ref):
    # x_ref: (C_in, TILE_T) native dtype; w_ref: (C_out, C_in) f32; b_ref: (C_out, 1) f32
    # o_ref: (C_out, TILE_T) output dtype
    x = x_ref[...].astype(jnp.float32)  # in-kernel cast: free VPU work under the HBM roofline
    acc = jnp.dot(w_ref[...], x, preferred_element_type=jnp.float32)
    o_ref[...] = (acc + b_ref[...]).astype(o_ref.dtype)


def _round_down_128(x):
    return max(128, (x // 128) * 128)


def _round_up_128(x):
    return ((x + 127) // 128) * 128


def _choose_tile_t(T, N, Cin, Cout, in_bytes, out_bytes, tile_vmem_budget):
    """Size the T tile against a VMEM budget for the double-buffered in/out tiles."""
    per_lane = 2 * (Cin * in_bytes + Cout * out_bytes)  # 2 buffers * (in row + out row) per lane
    max_tile = _round_down_128(tile_vmem_budget // per_lane)
    if T <= max_tile:
        tile_t = T          # full extent: always layout-legal, fits the budget
    else:
        tile_t = max_tile   # 128-multiple; unaligned T -> masked partial last block
    # v7x has 2 TensorCores; with N == 1 make sure there are >= 2 grid steps.
    if N == 1 and T >= 256 and pl.cdiv(T, tile_t) < 2:
        tile_t = _round_up_128(pl.cdiv(T, 2))
    return tile_t


def conv1x1_pallas(audio, w_eff, bias, *, tile_t=None,
                   tile_vmem_budget=8 << 20, out_dtype=None):
    """1x1 conv: audio (N, Cin, T), w_eff (Cout, Cin), bias (Cout, 1) -> (N, Cout, T)."""
    N, Cin, T = audio.shape
    Cout = w_eff.shape[0]
    if out_dtype is None:
        out_dtype = audio.dtype
    in_bytes = jnp.dtype(audio.dtype).itemsize
    out_bytes = jnp.dtype(out_dtype).itemsize
    param_bytes = jnp.dtype(w_eff.dtype).itemsize

    if tile_t is None:
        tile_t = _choose_tile_t(T, N, Cin, Cout, in_bytes, out_bytes, tile_vmem_budget)
    grid = (N, pl.cdiv(T, tile_t))

    # Double-buffered x/out tiles + (double-buffered) resident weight/bias, plus headroom.
    vmem_need = (2 * tile_t * (Cin * in_bytes + Cout * out_bytes)
                 + 2 * (Cout * Cin + Cout) * param_bytes)
    vmem_limit = max(16 << 20, int(vmem_need * 1.25) + (2 << 20))

    cost = pl.CostEstimate(
        flops=2 * N * T * Cout * Cin,
        transcendentals=0,
        bytes_accessed=(N * T * Cin * in_bytes
                        + N * T * Cout * out_bytes
                        + (Cout * Cin + Cout) * param_bytes),
    )

    return pl.pallas_call(
        _conv1x1_kernel,
        out_shape=jax.ShapeDtypeStruct((N, Cout, T), out_dtype),
        grid_spec=pltpu.PrefetchScalarGridSpec(
            num_scalar_prefetch=0,
            grid=grid,
            in_specs=[
                # x tile: batch dim squeezed, T in lanes.
                pl.BlockSpec((None, Cin, tile_t), lambda n, t: (n, 0, t)),
                # weight / bias: pinned resident in VMEM across the whole grid.
                pl.BlockSpec((Cout, Cin), lambda n, t: (0, 0)),
                pl.BlockSpec((Cout, 1), lambda n, t: (0, 0)),
            ],
            out_specs=pl.BlockSpec((None, Cout, tile_t), lambda n, t: (n, 0, t)),
        ),
        compiler_params=pltpu.CompilerParams(
            dimension_semantics=("parallel", "parallel"),
            vmem_limit_bytes=vmem_limit,
        ),
        cost_estimate=cost,
    )(audio, w_eff, bias)


class WNPallas:
    """JAX/Pallas equivalent of the PyTorch WN module (start 1x1 conv only)."""

    def __init__(self, n_in_channels, n_channels, key):
        self.n_in_channels = n_in_channels
        self.n_channels = n_channels
        kv, kb = jax.random.split(key)
        # Conv2d(C_in, C_out, 1) weight: (C_out, C_in, 1, 1), PyTorch-style uniform init.
        fan_in = n_in_channels  # * 1 * 1 kernel
        bound = 1.0 / jnp.sqrt(jnp.asarray(fan_in, jnp.float32))
        v = jax.random.uniform(kv, (n_channels, n_in_channels, 1, 1),
                               jnp.float32, -bound, bound)
        # weight_norm(name='weight', dim=0): g initialized to ||v|| per out-channel.
        g = jnp.sqrt(jnp.sum(v ** 2, axis=(1, 2, 3)))           # (C_out,)
        b = jax.random.uniform(kb, (n_channels,), jnp.float32, -bound, bound)
        self.v, self.g, self.b = v, g, b

    def _effective_weight(self):
        # W = g * v / ||v||, norm over dims (1,2,3) -> shape (C_out, C_in)
        norm = jnp.sqrt(jnp.sum(self.v ** 2, axis=(1, 2, 3), keepdims=True))
        w = self.g[:, None, None, None] * self.v / norm
        return w[:, :, 0, 0]                                    # (C_out, C_in)

    def __call__(self, forward_input):
        audio, spect = forward_input  # spect is unused, matching the PyTorch forward
        N, Cin, T = audio.shape
        assert Cin == self.n_in_channels
        w_eff = self._effective_weight()                        # (C_out, C_in), f32
        # Native input dtype in, native dtype out: no wrapper-side casts (no extra HBM pass).
        return conv1x1_pallas(audio, w_eff, self.b[:, None])


if __name__ == "__main__":
    key = jax.random.PRNGKey(0)
    k_param, k_audio, k_spect = jax.random.split(key, 3)

    n_in_channels = 4
    n_channels = 32
    N, T = 2, 16

    wn = WNPallas(n_in_channels, n_channels, k_param)
    w_eff = wn._effective_weight()

    # --- basic forward at the module's small shapes (f32) ---
    audio = jax.random.normal(k_audio, (N, n_in_channels, T), jnp.float32)
    spect = jax.random.normal(k_spect, (N, 8, T), jnp.float32)  # unused by forward
    out = jax.block_until_ready(wn((audio, spect)))
    ref = jnp.einsum("oc,nct->not", w_eff, audio) + wn.b[None, :, None]
    assert out.shape == (N, n_channels, T)
    assert out.dtype == audio.dtype
    assert jnp.allclose(out, ref, atol=1e-5, rtol=1e-5)

    # --- multi-tile pipelined path (grid over N and T tiles, exact tiling) ---
    T2 = 384
    audio2 = jax.random.normal(k_audio, (N, n_in_channels, T2), jnp.float32)
    out2 = jax.block_until_ready(conv1x1_pallas(audio2, w_eff, wn.b[:, None], tile_t=128))
    ref2 = jnp.einsum("oc,nct->not", w_eff, audio2) + wn.b[None, :, None]
    assert out2.shape == (N, n_channels, T2)
    assert jnp.allclose(out2, ref2, atol=1e-5, rtol=1e-5)

    # --- unaligned T -> masked partial last block (no full-T VMEM blowup path) ---
    T3 = 300
    audio3 = jax.random.normal(k_audio, (N, n_in_channels, T3), jnp.float32)
    out3 = jax.block_until_ready(conv1x1_pallas(audio3, w_eff, wn.b[:, None], tile_t=128))
    ref3 = jnp.einsum("oc,nct->not", w_eff, audio3) + wn.b[None, :, None]
    assert out3.shape == (N, n_channels, T3)
    assert jnp.allclose(out3, ref3, atol=1e-5, rtol=1e-5)

    # --- bf16 activations: native dtype in, native dtype out (half the writeback bytes) ---
    audio4 = audio2.astype(jnp.bfloat16)
    out4 = jax.block_until_ready(conv1x1_pallas(audio4, w_eff, wn.b[:, None]))
    ref4 = (jnp.einsum("oc,nct->not", w_eff, audio4.astype(jnp.float32))
            + wn.b[None, :, None]).astype(jnp.bfloat16)
    assert out4.dtype == jnp.bfloat16
    assert jnp.allclose(out4.astype(jnp.float32), ref4.astype(jnp.float32),
                        atol=2e-2, rtol=2e-2)

    print("KERNEL_OK")
</pallas_src>

<mosaic_0001>
module attributes {stable_mosaic.version = 11 : i64} {
  func.func @_conv1x1_kernel(%arg0: i32, %arg1: i32, %arg2: memref<1x4x16xf32, #tpu.memory_space<vmem>>, %arg3: memref<32x4xf32, #tpu.memory_space<vmem>>, %arg4: memref<32x1xf32, #tpu.memory_space<vmem>>, %arg5: memref<1x32x16xf32, #tpu.memory_space<vmem>>) attributes {dimension_semantics = [#tpu.dimension_semantics<parallel>, #tpu.dimension_semantics<parallel>], iteration_bounds = array<i64: 2, 1>, scalar_prefetch = 0 : i64, scratch_operands = 0 : i64, tpu.core_type = #tpu.core_type<tc>, window_params = [{transform_indices = @transform_0, window_bounds = array<i64: 1, 4, 16>}, {pipeline_mode = #tpu.pipeline_mode<synchronous>, transform_indices = @transform_1, window_bounds = array<i64: 32, 4>}, {pipeline_mode = #tpu.pipeline_mode<synchronous>, transform_indices = @transform_2, window_bounds = array<i64: 32, 1>}, {transform_indices = @transform_3, window_bounds = array<i64: 1, 32, 16>}]} {
    %c0 = arith.constant 0 : index
    %c0_0 = arith.constant 0 : index
    %c0_1 = arith.constant 0 : index
    %0 = vector.load %arg2[%c0, %c0_0, %c0_1] : memref<1x4x16xf32, #tpu.memory_space<vmem>>, vector<1x4x16xf32>
    %1 = vector.shape_cast %0 : vector<1x4x16xf32> to vector<4x16xf32>
    %c0_2 = arith.constant 0 : index
    %c0_3 = arith.constant 0 : index
    %2 = vector.load %arg3[%c0_2, %c0_3] : memref<32x4xf32, #tpu.memory_space<vmem>>, vector<32x4xf32>
    %cst = arith.constant dense<0.000000e+00> : vector<32x16xf32>
    %3 = tpu.matmul %2, %1, %cst {dimension_numbers = #tpu.dot_dimension_numbers<[1], [0], [0], [1], [0, 0, 1, 1], [], []>} : vector<32x4xf32>, vector<4x16xf32>, vector<32x16xf32> -> vector<32x16xf32>
    %c0_4 = arith.constant 0 : index
    %c0_5 = arith.constant 0 : index
    %4 = vector.load %arg4[%c0_4, %c0_5] : memref<32x1xf32, #tpu.memory_space<vmem>>, vector<32x1xf32>
    %5 = vector.broadcast %4 : vector<32x1xf32> to vector<32x16xf32>
    %6 = arith.addf %3, %5 : vector<32x16xf32>
    %c0_6 = arith.constant 0 : index
    %c0_7 = arith.constant 0 : index
    %c0_8 = arith.constant 0 : index
    %7 = vector.load %arg5[%c0_6, %c0_7, %c0_8] : memref<1x32x16xf32, #tpu.memory_space<vmem>>, vector<1x32x16xf32>
    %8 = vector.shape_cast %7 : vector<1x32x16xf32> to vector<32x16xf32>
    %9 = vector.shape_cast %6 : vector<32x16xf32> to vector<1x32x16xf32>
    tpu.vector_store %arg5[%c0_6, %c0_7, %c0_8], %9 {strides = array<i32>} : memref<1x32x16xf32, #tpu.memory_space<vmem>>, vector<1x32x16xf32>,
    return
  }
  func.func @transform_0(%arg0: i32, %arg1: i32) -> (i32, i32, i32) {
    %c0_i32 = arith.constant 0 : i32
    %c0_i32_0 = arith.constant 0 : i32
    return %arg0, %c0_i32, %arg1 : i32, i32, i32
  }
  func.func @transform_1(%arg0: i32, %arg1: i32) -> (i32, i32) {
    %c0_i32 = arith.constant 0 : i32
    %c0_i32_0 = arith.constant 0 : i32
    %c0_i32_1 = arith.constant 0 : i32
    return %c0_i32, %c0_i32_0 : i32, i32
  }
  func.func @transform_2(%arg0: i32, %arg1: i32) -> (i32, i32) {
    %c0_i32 = arith.constant 0 : i32
    %c0_i32_0 = arith.constant 0 : i32
    %c0_i32_1 = arith.constant 0 : i32
    return %c0_i32, %c0_i32_0 : i32, i32
  }
  func.func @transform_3(%arg0: i32, %arg1: i32) -> (i32, i32, i32) {
    %c0_i32 = arith.constant 0 : i32
    %c0_i32_0 = arith.constant 0 : i32
    return %arg0, %c0_i32, %arg1 : i32, i32, i32
  }
}

</mosaic_0001>

<bundles_post_ra>
// kernel: tpu_custom_call.1
= control target key start
LH: loop header
LB: loop body
LE: loop exit
PB: predicated region body
PF: predicated region fallthrough
CT: control target
= control target key end

     0   :  { %s518_s12 = smov 0   ;;  %s520_s13 = smov 0   ;;  %s579_s0 = inlined_call_operand.vmem [shape: f32[2,4,16], index: 0, kind: input, shape index: {}]   ;;  %s580_s1 = inlined_call_operand.vmem [shape: f32[32,4], index: 1, kind: input, shape index: {}]   ;;  %s581_s2 = inlined_call_operand.vmem [shape: f32[32,1], index: 2, kind: input, shape index: {}]   ;;  %s582_s3 = inlined_call_operand.vmem [shape: f32[2,32,16], index: 3, kind: output, shape index: {}]  }
   0x1   :  { %s522_s14 = smov 0  }
   0x2 LB: > { %s25_s15 = sadd.s32 1, %s491_s13  ;;  %p419_p0 = scmp.ge.s32.totalorder %s495_s14, 1  ;;  %s495_s14 = sphi %s522_s14, %s13_s14   ;;  %s491_s13 = sphi %s520_s13, %s584_s13   ;;  %s487_s12 = sphi %s518_s12, %s583_s12  }
   0x3   : > { %p27_p1 = scmp.ge.s32.totalorder %s25_s15, 2  ;;  %p155_p2 = scmp.lt.s32.totalorder %s495_s14, 3 }
   0x5   : > { %s586_s15 = smov (%p27_p1, %s25_s15), 0  ;;  %p156_p3 = pnand %p419_p0, %p155_p2 }
   0x6   : > { %p184_p4 = scmp.lt.s32.totalorder (!%p156_p3), %s487_s12, 1  ;;  %v200_v0 = vld [vmem:[%s580_s1] sm:$0xff] (!%p156_p3)  ;;  %vm228_vm0 = vcmask (!%p156_p3), 31744   ;;  %v202_v1 = vld [vmem:[%s580_s1 + $0x10] sm:$0xff] (!%p156_p3)  ;;  %v497_v4 = vmov (!%p156_p3), 0   ;;  %vm241_vm1 = vcmask (!%p156_p3), 1043456  }
   0x7   : > { %159 = sbr.rel (%p156_p3) target bundleno = 236 (0xec), region = 32  ;;  %438 = vmatprep.mubr.msk.f32.mxu0 (!%p156_p3), %vm228_vm0, %v200_v0  ;;  %441 = vmatprep.mubr.msk.f32.mxu1 (!%p156_p3), %vm228_vm0, %v202_v1  ;;  %v206_v2 = vld [vmem:[%s581_s2 + $0x10] sm:$0xff] (!%p156_p3)  ;;  %v204_v3 = vld [vmem:[%s581_s2] sm:$0xff] (!%p156_p3)  ;;  %v201_v6 = vld [vmem:[%s580_s1 + $0x8] sm:$0xff] (!%p156_p3)  ;;  %vm330_vm2 = vcmask (!%p156_p3), 130048  }
   0x8   : > { %472 = vset.pattern.permute.xlu1 (!%p156_p3), %v497_v4  ;;  %471 = vset.pattern.permute.xlu0 (!%p156_p3), %v497_v4  ;;  %v203_v7 = vld [vmem:[%s580_s1 + $0x18] sm:$0xff] (!%p156_p3)  ;;  %v205_v9 = vld [vmem:[%s581_s2 + $0x8] sm:$0xff] (!%p156_p3) }
   0x9   : > { %220 = vperm.xlu1 (!%p156_p3), %472, %v206_v2   ;;  %210 = vperm.xlu0 (!%p156_p3), %471, %v204_v3   ;;  %v207_v8 = vld [vmem:[%s581_s2 + $0x18] sm:$0xff] (!%p156_p3) }
   0xd   : > { %225 = vperm.xlu1 (!%p156_p3), %472, %v207_v8   ;;  %215 = vperm.xlu0 (!%p156_p3), %471, %v205_v9  }
   0xe   : > { %s588_s12 = smov (!%p184_p4, %s487_s12), 1 }
   0xf   : > { %s420_s24 = sshll.u32 %s588_s12, 2  ;;  %s430_s9 = sshll.u32 %s588_s12, 5 }
  0x10   : > { %s190_s27 = scalar_lea.vmem %s579_s0, %s420_s24  ;;  %s198_s16 = scalar_lea.vmem %s582_s3, %s430_s9 }
  0x11   : > { %v199_v5 = vld [vmem:[%s190_s27] sm:$0xf] }
  0x12   : > { %436 = vmatprep.subr.msk.mxu0 %vm241_vm1, %v199_v5  ;;  %444 = vmatprep.subr.msk.mxu1 %vm241_vm1, %v199_v5 }
  0x13   : > { %437 = vmatpush3.msk.msra.mxu0 %vm241_vm1, %v199_v5  ;;  %445 = vmatpush3.msk.msra.mxu1 %vm241_vm1, %v199_v5 }
  0x14   : > { %439 = vmatmul.mubr.msk.f32.vlgmr.msra.gmra.mrb[0].mxu0 %vm228_vm0, %v201_v6  ;;  %442 = vmatmul.mubr.msk.f32.vlgmr.msra.gmra.mrb[0].mxu1 %vm228_vm0, %v203_v7 }
  0x88   : > { %v221_v10 = vpop.permute.xlu1 %220  ;;  %v211_v11 = vpop.permute.xlu0 %210 }
  0x8c   : > { %v226_v12 = vpop.permute.xlu1 %225  ;;  %v216_v13 = vpop.permute.xlu0 %215 }
  0xe7   : > { %v440_v14 = vpop.f32.mrb[0].mxu0  ;;  %v443_v15 = vpop.f32.mrb[0].mxu1 }
  0xe8   : > { %v317_v16 = vadd.f32 %v440_v14, %v216_v13  ;;  %v327_v17 = vadd.f32 %v443_v15, %v226_v12  ;;  %v311_v18 = vpop.f32.mrb[1].mxu0  ;;  %v321_v19 = vpop.f32.mrb[1].mxu1 }
  0xe9   : > { %v312_v20 = vadd.f32 %v311_v18, %v211_v11  ;;  %v322_v21 = vadd.f32 %v321_v19, %v221_v10 }
  0xea   : > { %332 = vst.msk [vmem:[%s198_s16 + $0x8] sm:$0xff] %vm330_vm2, %v317_v16  ;;  %334 = vst.msk [vmem:[%s198_s16 + $0x18] sm:$0xff] %vm330_vm2, %v327_v17 }
  0xeb   : > { %331 = vst.msk [vmem:[%s198_s16] sm:$0xff] %vm330_vm2, %v312_v20  ;;  %333 = vst.msk [vmem:[%s198_s16 + $0x10] sm:$0xff] %vm330_vm2, %v322_v21 }
  0xec PF: > { %s13_s14 = sadd.s32 1, %s495_s14   ;;  %s583_s12 = smov %s491_s13 }
  0xed   : > { %p10_p5 = scmp.ge.s32.totalorder %s13_s14, 4   ;;  %s584_s13 = smov %s586_s15 }
  0xef   :  { %12 = sbr.rel (!%p10_p5) target bundleno = 2 (0x2), region = 62 }

</bundles_post_ra>
